<compile_context>
chip_gen: v5e
topology: v5e:2x2
jax: 0.10.0
libtpu: 0.0.40
codegen_flags: <defaults>
</compile_context>

<pallas_src>
import functools

import jax
import jax.numpy as jnp
from jax import lax
from jax.experimental import pallas as pl
from jax.experimental.pallas import tpu as pltpu


def _round_up(x, m):
    return (x + m - 1) // m * m


def _decoder_fused_kernel(T, HP,
                          x_ref,       # (TP, HP)  gathered embedding rows (pre-relu)
                          wih_ref,     # (HP, 3*HP) gate-concatenated, pre-transposed
                          whh_ref,     # (HP, 3*HP) gate-concatenated, pre-transposed
                          b_sum_ref,   # (1, 3*HP)  [bir+bhr | biz+bhz | bin]
                          b_hn_ref,    # (1, HP)    bhn (kept separate: scaled by r)
                          h0_ref,      # (1, HP)    initial hidden
                          wfc_ref,     # (HP, OP)
                          bfc_ref,     # (1, OP)    padded lanes carry -1e30
                          logp_ref,    # (TP, OP)   out: per-step log-probs
                          hout_ref,    # (1, HP)    out: final hidden
                          gi_scratch,  # VMEM (TP, 3*HP) input-side gate slab
                          h_hist):     # VMEM (TP, HP)   hidden-state history
    # ---- batched pre-phase: input-side gate matmul for all T steps at once ----
    x = jnp.maximum(x_ref[...], 0.0)                            # relu(embedding)
    gi_scratch[...] = (
        jnp.dot(x, wih_ref[...], preferred_element_type=jnp.float32)
        + b_sum_ref[...])

    h_hist[...] = jnp.zeros_like(h_hist)                        # keep padded rows defined

    whh = whh_ref[...]
    b_hn = b_hn_ref[...]

    # ---- serial recurrence: only h @ Whh remains on the critical path ----
    def step(t, h):
        gi = gi_scratch[pl.ds(t, 1), :]                                        # (1, 3HP)
        gh = jnp.dot(h, whh, preferred_element_type=jnp.float32)               # (1, 3HP)
        # HP-aligned lane-group slices (cost-free vreg selects).
        r = jax.nn.sigmoid(gi[:, 0:HP] + gh[:, 0:HP])
        z = jax.nn.sigmoid(gi[:, HP:2 * HP] + gh[:, HP:2 * HP])
        n = jnp.tanh(gi[:, 2 * HP:3 * HP] + r * (gh[:, 2 * HP:3 * HP] + b_hn))
        h_new = (1.0 - z) * n + z * h
        h_hist[pl.ds(t, 1), :] = h_new
        return h_new

    h_final = lax.fori_loop(0, T, step, h0_ref[...], unroll=(T <= 32))
    hout_ref[...] = h_final.astype(hout_ref.dtype)              # unconditional, once

    # ---- batched post-phase: FC projection + log-softmax over all T rows ----
    logits = (jnp.dot(h_hist[...], wfc_ref[...], preferred_element_type=jnp.float32)
              + bfc_ref[...])
    m = jnp.max(logits, axis=-1, keepdims=True)
    lse = jnp.log(jnp.sum(jnp.exp(logits - m), axis=-1, keepdims=True)) + m
    logp_ref[...] = (logits - lse).astype(logp_ref.dtype)


def pack_decoder_params(emb, w_ih, b_ih, w_hh, b_hh, w_fc, b_fc):
    """One-time repack of PyTorch-layout weights (hoisted out of the decode path)."""
    V, H = emb.shape
    O = w_fc.shape[0]
    HP = _round_up(H, 128)
    OP = _round_up(O, 128)

    emb_p = jnp.zeros((V, HP), jnp.float32).at[:, :H].set(emb.astype(jnp.float32))

    def pack_gates(w):
        # (3H, H) row-stacked [r; z; n]  ->  (HP, 3*HP) so the kernel does v @ W.
        out = jnp.zeros((HP, 3 * HP), jnp.float32)
        for g in range(3):
            out = out.at[:H, g * HP:g * HP + H].set(w[g * H:(g + 1) * H, :].T)
        return out

    wih_p = pack_gates(w_ih.astype(jnp.float32))
    whh_p = pack_gates(w_hh.astype(jnp.float32))

    b_sum = jnp.zeros((1, 3 * HP), jnp.float32)
    b_sum = b_sum.at[0, 0:H].set(b_ih[0:H] + b_hh[0:H])                 # r gate, folded
    b_sum = b_sum.at[0, HP:HP + H].set(b_ih[H:2 * H] + b_hh[H:2 * H])   # z gate, folded
    b_sum = b_sum.at[0, 2 * HP:2 * HP + H].set(b_ih[2 * H:3 * H])       # n gate (input side)
    b_hn = jnp.zeros((1, HP), jnp.float32).at[0, :H].set(b_hh[2 * H:3 * H])

    wfc_p = jnp.zeros((HP, OP), jnp.float32).at[:H, :O].set(w_fc.T.astype(jnp.float32))
    # Padded output lanes get a very negative bias so log-softmax ignores them.
    bfc_p = jnp.full((1, OP), -1e30, jnp.float32).at[0, :O].set(b_fc.astype(jnp.float32))

    arrays = (emb_p, wih_p, whh_p, b_sum, b_hn, wfc_p, bfc_p)
    dims = dict(V=V, H=H, O=O, HP=HP, OP=OP)
    return arrays, dims


@jax.jit
def _decode_steps(tokens, h0_padded, emb_p, wih_p, whh_p, b_sum, b_hn, wfc_p, bfc_p):
    """All T decode steps in ONE pallas_call invocation (no grid)."""
    T = tokens.shape[0]
    V, HP = emb_p.shape
    OP = wfc_p.shape[1]
    TP = max(_round_up(T, 8), 8)          # sublane-aligned row count

    tok = jnp.clip(tokens.astype(jnp.int32), 0, V - 1)   # guard the gather
    # Embedding gather for all T tokens, hoisted off the serial path (tiny XLA gather).
    x = jnp.zeros((TP, HP), jnp.float32).at[:T].set(jnp.take(emb_p, tok, axis=0))

    kernel = functools.partial(_decoder_fused_kernel, T, HP)
    vmem_specs = [pl.BlockSpec(memory_space=pltpu.MemorySpace.VMEM) for _ in range(8)]

    logp, h_out = pl.pallas_call(
        kernel,
        out_shape=(
            jax.ShapeDtypeStruct((TP, OP), jnp.float32),
            jax.ShapeDtypeStruct((1, HP), jnp.float32),
        ),
        in_specs=vmem_specs,
        out_specs=(
            pl.BlockSpec(memory_space=pltpu.MemorySpace.VMEM),
            pl.BlockSpec(memory_space=pltpu.MemorySpace.VMEM),
        ),
        scratch_shapes=[
            pltpu.VMEM((TP, 3 * HP), jnp.float32),   # gi slab
            pltpu.VMEM((TP, HP), jnp.float32),       # h history
        ],
    )(x, wih_p, whh_p, b_sum, b_hn, h0_padded, wfc_p, bfc_p)

    return logp[:T], h_out


def vanilla_decoder_decode(tokens, hidden_z, packed):
    """T teacher-forced decode steps fused into one kernel launch."""
    arrays, dims = packed
    H, O, HP = dims["H"], dims["O"], dims["HP"]
    tokens = jnp.asarray(tokens, jnp.int32).reshape(-1)
    # Re-zero padded hidden lanes explicitly (callers may pass only (1,1,H)).
    h0 = jnp.zeros((1, HP), jnp.float32).at[:, :H].set(
        hidden_z.reshape(1, H).astype(jnp.float32))
    logp, h_out = _decode_steps(tokens, h0, *arrays)
    return logp[:, :O], h_out[:, :H].reshape(1, 1, H)


def vanilla_decoder_forward(prev_output, hidden_z, packed):
    """Single decode step — mirrors VanillaDecoder.forward: ((1, O), (1, 1, H))."""
    return vanilla_decoder_decode(
        jnp.asarray(prev_output, jnp.int32).reshape(1), hidden_z, packed)


def _reference_forward(prev_output, hidden_z, emb, w_ih, b_ih, w_hh, b_hh, w_fc, b_fc):
    """Pure-JAX reference mirroring the PyTorch forward."""
    H = emb.shape[1]
    tok = jnp.asarray(prev_output, jnp.int32).reshape(())
    x = jnp.maximum(emb[tok], 0.0).reshape(1, H)
    h = hidden_z.reshape(1, H)
    gi = x @ w_ih.T + b_ih
    gh = h @ w_hh.T + b_hh
    ir, iz, inn = gi[:, :H], gi[:, H:2 * H], gi[:, 2 * H:]
    hr, hz, hn = gh[:, :H], gh[:, H:2 * H], gh[:, 2 * H:]
    r = jax.nn.sigmoid(ir + hr)
    z = jax.nn.sigmoid(iz + hz)
    n = jnp.tanh(inn + r * hn)
    h_new = (1.0 - z) * n + z * h
    logits = h_new @ w_fc.T + b_fc
    return jax.nn.log_softmax(logits, axis=1), h_new.reshape(1, 1, H)


if __name__ == "__main__":
    n_hidden = 32      # H
    n_output = 64      # vocab / output classes (Embedding(n_output, n_hidden))
    T = 6              # decode steps for the fused multi-step check
    H, V = n_hidden, n_output

    key = jax.random.PRNGKey(0)
    ks = jax.random.split(key, 9)
    bound = 1.0 / jnp.sqrt(jnp.float32(H))

    # Deterministic synthetic parameters (PyTorch-style layouts).
    emb = jax.random.normal(ks[0], (V, H), jnp.float32)
    w_ih = jax.random.uniform(ks[1], (3 * H, H), jnp.float32, -bound, bound)
    b_ih = jax.random.uniform(ks[2], (3 * H,), jnp.float32, -bound, bound)
    w_hh = jax.random.uniform(ks[3], (3 * H, H), jnp.float32, -bound, bound)
    b_hh = jax.random.uniform(ks[4], (3 * H,), jnp.float32, -bound, bound)
    w_fc = jax.random.uniform(ks[5], (n_output, H), jnp.float32, -bound, bound)
    b_fc = jax.random.uniform(ks[6], (n_output,), jnp.float32, -bound, bound)

    prev_output = jnp.array([3], dtype=jnp.int32)
    hidden_z = jax.random.normal(ks[7], (1, 1, H), jnp.float32)
    tokens = jax.random.randint(ks[8], (T,), 0, V, jnp.int32)

    # One-time weight repack (hoisted out of the decode path).
    packed = pack_decoder_params(emb, w_ih, b_ih, w_hh, b_hh, w_fc, b_fc)

    # --- single step (matches VanillaDecoder.forward) ---
    out, h_out = vanilla_decoder_forward(prev_output, hidden_z, packed)
    jax.block_until_ready((out, h_out))
    ref_out, ref_h = _reference_forward(
        prev_output, hidden_z, emb, w_ih, b_ih, w_hh, b_hh, w_fc, b_fc)
    assert out.shape == (1, n_output) and h_out.shape == (1, 1, H)
    assert jnp.allclose(out, ref_out, atol=1e-5, rtol=1e-5)
    assert jnp.allclose(h_out, ref_h, atol=1e-5, rtol=1e-5)

    # --- T fused steps in one pallas_call (single launch, in-kernel recurrence) ---
    outs, h_T = vanilla_decoder_decode(tokens, hidden_z, packed)
    jax.block_until_ready((outs, h_T))
    h_ref = hidden_z
    ref_rows = []
    for t in range(T):
        o_t, h_ref = _reference_forward(
            tokens[t], h_ref, emb, w_ih, b_ih, w_hh, b_hh, w_fc, b_fc)
        ref_rows.append(o_t)
    ref_rows = jnp.concatenate(ref_rows, axis=0)
    assert outs.shape == (T, n_output) and h_T.shape == (1, 1, H)
    assert jnp.allclose(outs, ref_rows, atol=1e-5, rtol=1e-5)
    assert jnp.allclose(h_T, h_ref, atol=1e-5, rtol=1e-5)

    print("KERNEL_OK")
</pallas_src>

<mosaic_0001>
module attributes {stable_mosaic.version = 11 : i64} {
  func.func @_decoder_fused_kernel(%arg0: memref<8x128xf32, #tpu.memory_space<vmem>>, %arg1: memref<128x384xf32, #tpu.memory_space<vmem>>, %arg2: memref<128x384xf32, #tpu.memory_space<vmem>>, %arg3: memref<1x384xf32, #tpu.memory_space<vmem>>, %arg4: memref<1x128xf32, #tpu.memory_space<vmem>>, %arg5: memref<1x128xf32, #tpu.memory_space<vmem>>, %arg6: memref<128x128xf32, #tpu.memory_space<vmem>>, %arg7: memref<1x128xf32, #tpu.memory_space<vmem>>, %arg8: memref<8x128xf32, #tpu.memory_space<vmem>>, %arg9: memref<1x128xf32, #tpu.memory_space<vmem>>, %arg10: memref<8x384xf32, #tpu.memory_space<vmem>>, %arg11: memref<8x128xf32, #tpu.memory_space<vmem>>) attributes {dimension_semantics = [], scalar_prefetch = 0 : i64, scratch_operands = 2 : i64, tpu.core_type = #tpu.core_type<tc>} {
    %c0 = arith.constant 0 : index
    %c0_0 = arith.constant 0 : index
    %0 = vector.load %arg0[%c0, %c0_0] : memref<8x128xf32, #tpu.memory_space<vmem>>, vector<8x128xf32>
    %cst = arith.constant 0.000000e+00 : f32
    %1 = vector.broadcast %cst : f32 to vector<8x128xf32>
    %2 = arith.maximumf %0, %1 : vector<8x128xf32>
    %c0_1 = arith.constant 0 : index
    %c0_2 = arith.constant 0 : index
    %3 = vector.load %arg1[%c0_1, %c0_2] : memref<128x384xf32, #tpu.memory_space<vmem>>, vector<128x384xf32>
    %cst_3 = arith.constant dense<0.000000e+00> : vector<8x384xf32>
    %4 = tpu.matmul %2, %3, %cst_3 {dimension_numbers = #tpu.dot_dimension_numbers<[1], [0], [0], [1], [0, 0, 1, 1], [], []>} : vector<8x128xf32>, vector<128x384xf32>, vector<8x384xf32> -> vector<8x384xf32>
    %c0_4 = arith.constant 0 : index
    %c0_5 = arith.constant 0 : index
    %5 = vector.load %arg3[%c0_4, %c0_5] : memref<1x384xf32, #tpu.memory_space<vmem>>, vector<1x384xf32>
    %6 = vector.broadcast %5 : vector<1x384xf32> to vector<8x384xf32>
    %7 = arith.addf %4, %6 : vector<8x384xf32>
    %c0_6 = arith.constant 0 : index
    %c0_7 = arith.constant 0 : index
    %8 = vector.load %arg10[%c0_6, %c0_7] : memref<8x384xf32, #tpu.memory_space<vmem>>, vector<8x384xf32>
    tpu.vector_store %arg10[%c0_6, %c0_7], %7 {strides = array<i32>} : memref<8x384xf32, #tpu.memory_space<vmem>>, vector<8x384xf32>,
    %cst_8 = arith.constant 0.000000e+00 : f32
    %9 = vector.broadcast %cst_8 : f32 to vector<8x128xf32>
    %c0_9 = arith.constant 0 : index
    %c0_10 = arith.constant 0 : index
    %10 = vector.load %arg11[%c0_9, %c0_10] : memref<8x128xf32, #tpu.memory_space<vmem>>, vector<8x128xf32>
    tpu.vector_store %arg11[%c0_9, %c0_10], %9 {strides = array<i32>} : memref<8x128xf32, #tpu.memory_space<vmem>>, vector<8x128xf32>,
    %c0_11 = arith.constant 0 : index
    %c0_12 = arith.constant 0 : index
    %11 = vector.load %arg2[%c0_11, %c0_12] : memref<128x384xf32, #tpu.memory_space<vmem>>, vector<128x384xf32>
    %c0_13 = arith.constant 0 : index
    %c0_14 = arith.constant 0 : index
    %12 = vector.load %arg4[%c0_13, %c0_14] : memref<1x128xf32, #tpu.memory_space<vmem>>, vector<1x128xf32>
    %c0_15 = arith.constant 0 : index
    %c0_16 = arith.constant 0 : index
    %13 = vector.load %arg5[%c0_15, %c0_16] : memref<1x128xf32, #tpu.memory_space<vmem>>, vector<1x128xf32>
    %c0_i32 = arith.constant 0 : i32
    %14 = arith.index_cast %c0_i32 : i32 to index
    %c0_17 = arith.constant 0 : index
    %15 = vector.load %arg10[%14, %c0_17] : memref<8x384xf32, #tpu.memory_space<vmem>>, vector<1x384xf32>
    %cst_18 = arith.constant dense<0.000000e+00> : vector<1x384xf32>
    %16 = tpu.matmul %13, %11, %cst_18 {dimension_numbers = #tpu.dot_dimension_numbers<[1], [0], [0], [1], [0, 0, 1, 1], [], []>} : vector<1x128xf32>, vector<128x384xf32>, vector<1x384xf32> -> vector<1x384xf32>
    %17 = vector.extract_strided_slice %15 {offsets = [0, 0], sizes = [1, 128], strides = [1, 1]} : vector<1x384xf32> to vector<1x128xf32>
    %18 = vector.extract_strided_slice %16 {offsets = [0, 0], sizes = [1, 128], strides = [1, 1]} : vector<1x384xf32> to vector<1x128xf32>
    %19 = arith.addf %17, %18 : vector<1x128xf32>
    %20 = arith.negf %19 : vector<1x128xf32>
    %21 = math.exp %20 : vector<1x128xf32>
    %cst_19 = arith.constant 1.000000e+00 : f32
    %22 = vector.broadcast %cst_19 : f32 to vector<1x128xf32>
    %23 = arith.addf %22, %21 : vector<1x128xf32>
    %24 = arith.divf %22, %23 : vector<1x128xf32>
    %25 = vector.extract_strided_slice %15 {offsets = [0, 128], sizes = [1, 128], strides = [1, 1]} : vector<1x384xf32> to vector<1x128xf32>
    %26 = vector.extract_strided_slice %16 {offsets = [0, 128], sizes = [1, 128], strides = [1, 1]} : vector<1x384xf32> to vector<1x128xf32>
    %27 = arith.addf %25, %26 : vector<1x128xf32>
    %28 = arith.negf %27 : vector<1x128xf32>
    %29 = math.exp %28 : vector<1x128xf32>
    %cst_20 = arith.constant 1.000000e+00 : f32
    %30 = vector.broadcast %cst_20 : f32 to vector<1x128xf32>
    %31 = arith.addf %30, %29 : vector<1x128xf32>
    %32 = arith.divf %30, %31 : vector<1x128xf32>
    %33 = vector.extract_strided_slice %15 {offsets = [0, 256], sizes = [1, 128], strides = [1, 1]} : vector<1x384xf32> to vector<1x128xf32>
    %34 = vector.extract_strided_slice %16 {offsets = [0, 256], sizes = [1, 128], strides = [1, 1]} : vector<1x384xf32> to vector<1x128xf32>
    %35 = arith.addf %34, %12 : vector<1x128xf32>
    %36 = arith.mulf %24, %35 : vector<1x128xf32>
    %37 = arith.addf %33, %36 : vector<1x128xf32>
    %38 = math.tanh %37 : vector<1x128xf32>
    %cst_21 = arith.constant 1.000000e+00 : f32
    %39 = vector.broadcast %cst_21 : f32 to vector<1x128xf32>
    %40 = arith.subf %39, %32 : vector<1x128xf32>
    %41 = arith.mulf %40, %38 : vector<1x128xf32>
    %42 = arith.mulf %32, %13 : vector<1x128xf32>
    %43 = arith.addf %41, %42 : vector<1x128xf32>
    %44 = arith.index_cast %c0_i32 : i32 to index
    %c0_22 = arith.constant 0 : index
    %45 = vector.load %arg11[%44, %c0_22] : memref<8x128xf32, #tpu.memory_space<vmem>>, vector<1x128xf32>
    tpu.vector_store %arg11[%44, %c0_22], %43 {strides = array<i32>} : memref<8x128xf32, #tpu.memory_space<vmem>>, vector<1x128xf32>,
    %c1_i32 = arith.constant 1 : i32
    %c0_23 = arith.constant 0 : index
    %c0_24 = arith.constant 0 : index
    %46 = vector.load %arg9[%c0_23, %c0_24] : memref<1x128xf32, #tpu.memory_space<vmem>>, vector<1x128xf32>
    tpu.vector_store %arg9[%c0_23, %c0_24], %43 {strides = array<i32>} : memref<1x128xf32, #tpu.memory_space<vmem>>, vector<1x128xf32>,
    %c0_25 = arith.constant 0 : index
    %c0_26 = arith.constant 0 : index
    %47 = vector.load %arg11[%c0_25, %c0_26] : memref<8x128xf32, #tpu.memory_space<vmem>>, vector<8x128xf32>
    %c0_27 = arith.constant 0 : index
    %c0_28 = arith.constant 0 : index
    %48 = vector.load %arg6[%c0_27, %c0_28] : memref<128x128xf32, #tpu.memory_space<vmem>>, vector<128x128xf32>
    %cst_29 = arith.constant dense<0.000000e+00> : vector<8x128xf32>
    %49 = tpu.matmul %47, %48, %cst_29 {dimension_numbers = #tpu.dot_dimension_numbers<[1], [0], [0], [1], [0, 0, 1, 1], [], []>} : vector<8x128xf32>, vector<128x128xf32>, vector<8x128xf32> -> vector<8x128xf32>
    %c0_30 = arith.constant 0 : index
    %c0_31 = arith.constant 0 : index
    %50 = vector.load %arg7[%c0_30, %c0_31] : memref<1x128xf32, #tpu.memory_space<vmem>>, vector<1x128xf32>
    %51 = vector.broadcast %50 : vector<1x128xf32> to vector<8x128xf32>
    %52 = arith.addf %49, %51 : vector<8x128xf32>
    %cst_32 = arith.constant dense<0xFF800000> : vector<8xf32>
    %53 = vector.multi_reduction <maximumf>, %52, %cst_32 [1] : vector<8x128xf32> to vector<8xf32>
    %54 = vector.shape_cast %53 : vector<8xf32> to vector<8x1xf32>
    %55 = vector.broadcast %54 : vector<8x1xf32> to vector<8x128xf32>
    %56 = arith.subf %52, %55 : vector<8x128xf32>
    %57 = math.exp %56 : vector<8x128xf32>
    %cst_33 = arith.constant dense<0.000000e+00> : vector<8xf32>
    %58 = vector.multi_reduction <add>, %57, %cst_33 [1] : vector<8x128xf32> to vector<8xf32>
    %59 = vector.shape_cast %58 : vector<8xf32> to vector<8x1xf32>
    %60 = math.log %59 : vector<8x1xf32>
    %61 = arith.addf %60, %54 : vector<8x1xf32>
    %62 = vector.broadcast %61 : vector<8x1xf32> to vector<8x128xf32>
    %63 = arith.subf %52, %62 : vector<8x128xf32>
    %c0_34 = arith.constant 0 : index
    %c0_35 = arith.constant 0 : index
    %64 = vector.load %arg8[%c0_34, %c0_35] : memref<8x128xf32, #tpu.memory_space<vmem>>, vector<8x128xf32>
    tpu.vector_store %arg8[%c0_34, %c0_35], %63 {strides = array<i32>} : memref<8x128xf32, #tpu.memory_space<vmem>>, vector<8x128xf32>,
    return
  }
}

</mosaic_0001>

<bundles_post_ra>
// kernel: _decode_steps.1
= control target key start
LH: loop header
LB: loop body
LE: loop exit
PB: predicated region body
PF: predicated region fallthrough
CT: control target
= control target key end

     0   :  { %15 = vsyncpa [#allocation5], 0  ;;  %s670_s0 = inlined_call_operand.vmem [shape: f32[8,128], index: 0, kind: input, shape index: {}]   ;;  %s671_s1 = inlined_call_operand.hbm [shape: f32[128,384], index: 1, kind: input, shape index: {}]   ;;  %s672_s2 = inlined_call_operand.hbm [shape: f32[128,384], index: 2, kind: input, shape index: {}]   ;;  %s673_s3 = inlined_call_operand.vmem [shape: f32[1,384], index: 3, kind: input, shape index: {}]   ;;  %s674_s4 = inlined_call_operand.vmem [shape: f32[1,128], index: 4, kind: input, shape index: {}]   ;;  %s675_s5 = inlined_call_operand.vmem [shape: f32[1,128], index: 5, kind: input, shape index: {}]   ;;  %s676_s6 = inlined_call_operand.hbm [shape: f32[128,128], index: 6, kind: input, shape index: {}]   ;;  %s677_s7 = inlined_call_operand.vmem [shape: f32[1,128], index: 7, kind: input, shape index: {}]   ;;  %s678_s8 = inlined_call_operand.vmem [shape: f32[8,128], index: 8, kind: output, shape index: {0}]   ;;  %s679_s9 = inlined_call_operand.hbm [shape: f32[1,128], index: 9, kind: output, shape index: {1}]  }
   0x1   :  { %16 = vsyncpa [#allocation8], 0 }
   0x2   :  { %17 = vsyncpa [#allocation6], 0  ;;  %s37_s11 = sshll.u32 %s672_s2, 4  ;;  %s570_s12 = smov [#allocation7]   ;;  %s38_s11 = int_to_ptr.hbm [resolvable:$true] %s37_s11 }
   0x3   :  { %s39_s13 = sshll.u32 %s570_s12, 4  ;;  %s24_s16 = sshll.u32 %s671_s1, 4  ;;  %s40_s13 = int_to_ptr.vmem [resolvable:$true] %s39_s13  ;;  %s25_s16 = int_to_ptr.hbm [resolvable:$true] %s24_s16 }
   0x4   :  { %s571_s17 = smov 384   ;;  %s572_s18 = smov 24  }
   0x5   :  { %45 = dma.hbm_to_vmem [thread:$0]  %s38_s11, 6144, %s40_s13, [#allocation8], %s571_s17, %s571_s17, %s572_s18  }
   0x6   :  { %s573_s19 = smov [#allocation4]   ;;  %s56_s23 = sshll.u32 %s676_s6, 4  ;;  %s57_s23 = int_to_ptr.hbm [resolvable:$true] %s56_s23 }
   0x7   :  { %s26_s20 = sshll.u32 %s573_s19, 4  ;;  %s574_s2 = smov [#allocation9]   ;;  %s27_s20 = int_to_ptr.vmem [resolvable:$true] %s26_s20 }
   0x8   :  { %32 = dma.hbm_to_vmem [thread:$0]  %s25_s16, 6144, %s27_s20, [#allocation5], %s571_s17, %s571_s17, %s572_s18  }
   0x9   :  { %s58_s24 = sshll.u32 %s574_s2, 4  ;;  %s575_s25 = smov 128   ;;  %s59_s24 = int_to_ptr.vmem [resolvable:$true] %s58_s24 }
   0xa   :  { %s576_s26 = smov 8  }
   0xb   :  { %64 = dma.hbm_to_vmem [thread:$0]  %s57_s23, 2048, %s59_s24, [#allocation8], %s575_s25, %s575_s25, %s576_s26  }
   0xc   :  { %564 = dma.done.wait [#allocation5], 6144  }
   0xd   :  { %565 = vsyncadd [#allocation5], 4294961152 }
   0xe   :  { %566 = dma.done.wait [#allocation8], 8192  }
   0xf   :  { %567 = vsyncadd [#allocation8], 4294959104  ;;  %v126_v0 = vld [vmem:[#allocation4 + $0x168] sm:$0xff]  ;;  %v128_v1 = vld [vmem:[#allocation4 + $0x178] sm:$0xff]  ;;  %s578_s10 = smov [#allocation10]   ;;  %s429_s14 = sshll.u32 %s679_s9, 4  ;;  %s430_s14 = int_to_ptr.hbm [resolvable:$true] %s429_s14 }
  0x10   :  { %v123_v2 = vld [vmem:[#allocation4 + $0x150] sm:$0xff]  ;;  %137 = vmatpush.msra.mxu0 %v126_v0  ;;  %177 = vmatpush.msra.mxu2 %v128_v1  ;;  %v125_v3 = vld [vmem:[#allocation4 + $0x160] sm:$0xff]  ;;  %v120_v4 = vld [vmem:[#allocation4 + $0x138] sm:$0xff]  ;;  %s427_s11 = sshll.u32 %s578_s10, 4  ;;  %s428_s11 = int_to_ptr.vmem [resolvable:$true] %s427_s11 }
  0x11   :  { %v122_v5 = vld [vmem:[#allocation4 + $0x148] sm:$0xff]  ;;  %v127_v6 = vld [vmem:[#allocation4 + $0x170] sm:$0xff]  ;;  %v124_v7 = vld [vmem:[#allocation4 + $0x158] sm:$0xff] }
  0x12   :  { %138 = vmatpush.msra.mxu0 %v123_v2  ;;  %178 = vmatpush.msra.mxu2 %v125_v3  ;;  %v117_v8 = vld [vmem:[#allocation4 + $0x120] sm:$0xff]  ;;  %v119_v9 = vld [vmem:[#allocation4 + $0x130] sm:$0xff]  ;;  %v246_v11 = vld [vmem:[#allocation7 + $0x168] sm:$0xff] }
  0x13   :  { %157 = vmatpush.msra.mxu1 %v127_v6  ;;  %v121_v10 = vld [vmem:[#allocation4 + $0x140] sm:$0xff]  ;;  %v114_v12 = vld [vmem:[#allocation4 + $0x108] sm:$0xff]  ;;  %v116_v13 = vld [vmem:[#allocation4 + $0x118] sm:$0xff]  ;;  %252 = vmatpush.msra.mxu3 %v246_v11 }
  0x14   :  { %139 = vmatpush.msra.mxu0 %v120_v4  ;;  %179 = vmatpush.msra.mxu2 %v122_v5  ;;  %v243_v14 = vld [vmem:[#allocation7 + $0x150] sm:$0xff]  ;;  %v118_v15 = vld [vmem:[#allocation4 + $0x128] sm:$0xff]  ;;  %v240_v16 = vld [vmem:[#allocation7 + $0x138] sm:$0xff] }
  0x15   :  { %158 = vmatpush.msra.mxu1 %v124_v7  ;;  %v111_v17 = vld [vmem:[#allocation4 + $0xf0] sm:$0xff]  ;;  %v113_v18 = vld [vmem:[#allocation4 + $0x100] sm:$0xff]  ;;  %253 = vmatpush.msra.mxu3 %v243_v14  ;;  %v108_v21 = vld [vmem:[#allocation4 + $0xd8] sm:$0xff] }
  0x16   :  { %140 = vmatpush.msra.mxu0 %v117_v8  ;;  %180 = vmatpush.msra.mxu2 %v119_v9  ;;  %v115_v19 = vld [vmem:[#allocation4 + $0x110] sm:$0xff]  ;;  %v237_v20 = vld [vmem:[#allocation7 + $0x120] sm:$0xff]  ;;  %v110_v22 = vld [vmem:[#allocation4 + $0xe8] sm:$0xff] }
  0x17   :  { %159 = vmatpush.msra.mxu1 %v121_v10  ;;  %254 = vmatpush.msra.mxu3 %v240_v16  ;;  %v112_v23 = vld [vmem:[#allocation4 + $0xf8] sm:$0xff]  ;;  %v234_v24 = vld [vmem:[#allocation7 + $0x108] sm:$0xff]  ;;  %v105_v25 = vld [vmem:[#allocation4 + $0xc0] sm:$0xff] }
  0x18   :  { %141 = vmatpush.msra.mxu0 %v114_v12  ;;  %181 = vmatpush.msra.mxu2 %v116_v13  ;;  %v107_v26 = vld [vmem:[#allocation4 + $0xd0] sm:$0xff]  ;;  %v109_v27 = vld [vmem:[#allocation4 + $0xe0] sm:$0xff]  ;;  %v102_v29 = vld [vmem:[#allocation4 + $0xa8] sm:$0xff] }
  0x19   :  { %160 = vmatpush.msra.mxu1 %v118_v15  ;;  %255 = vmatpush.msra.mxu3 %v237_v20  ;;  %v231_v28 = vld [vmem:[#allocation7 + $0xf0] sm:$0xff]  ;;  %v104_v30 = vld [vmem:[#allocation4 + $0xb8] sm:$0xff]  ;;  %v106_v31 = vld [vmem:[#allocation4 + $0xc8] sm:$0xff] }
  0x1a   :  { %142 = vmatpush.msra.mxu0 %v111_v17  ;;  %182 = vmatpush.msra.mxu2 %v113_v18  ;;  %v228_v32 = vld [vmem:[#allocation7 + $0xd8] sm:$0xff]  ;;  %v99_v33 = vld [vmem:[#allocation4 + $0x90] sm:$0xff]  ;;  %v101_v34 = vld [vmem:[#allocation4 + $0xa0] sm:$0xff] }
  0x1b   :  { %161 = vmatpush.msra.mxu1 %v115_v19  ;;  %256 = vmatpush.msra.mxu3 %v234_v24  ;;  %v103_v35 = vld [vmem:[#allocation4 + $0xb0] sm:$0xff]  ;;  %v225_v36 = vld [vmem:[#allocation7 + $0xc0] sm:$0xff]  ;;  %v96_v37 = vld [vmem:[#allocation4 + $0x78] sm:$0xff] }
  0x1c   :  { %143 = vmatpush.msra.mxu0 %v108_v21  ;;  %183 = vmatpush.msra.mxu2 %v110_v22  ;;  %v98_v38 = vld [vmem:[#allocation4 + $0x88] sm:$0xff]  ;;  %v100_v39 = vld [vmem:[#allocation4 + $0x98] sm:$0xff]  ;;  %v93_v41 = vld [vmem:[#allocation4 + $0x60] sm:$0xff] }
  0x1d   :  { %162 = vmatpush.msra.mxu1 %v112_v23  ;;  %257 = vmatpush.msra.mxu3 %v231_v28  ;;  %v222_v40 = vld [vmem:[#allocation7 + $0xa8] sm:$0xff]  ;;  %v95_v42 = vld [vmem:[#allocation4 + $0x70] sm:$0xff]  ;;  %v97_v43 = vld [vmem:[#allocation4 + $0x80] sm:$0xff] }
  0x1e   :  { %144 = vmatpush.msra.mxu0 %v105_v25  ;;  %184 = vmatpush.msra.mxu2 %v107_v26  ;;  %v219_v44 = vld [vmem:[#allocation7 + $0x90] sm:$0xff]  ;;  %v90_v45 = vld [vmem:[#allocation4 + $0x48] sm:$0xff]  ;;  %v92_v46 = vld [vmem:[#allocation4 + $0x58] sm:$0xff] }
  0x1f   :  { %163 = vmatpush.msra.mxu1 %v109_v27  ;;  %258 = vmatpush.msra.mxu3 %v228_v32  ;;  %v94_v47 = vld [vmem:[#allocation4 + $0x68] sm:$0xff]  ;;  %v216_v48 = vld [vmem:[#allocation7 + $0x78] sm:$0xff]  ;;  %v87_v49 = vld [vmem:[#allocation4 + $0x30] sm:$0xff] }
  0x20   :  { %145 = vmatpush.msra.mxu0 %v102_v29  ;;  %185 = vmatpush.msra.mxu2 %v104_v30  ;;  %v89_v50 = vld [vmem:[#allocation4 + $0x40] sm:$0xff]  ;;  %v91_v51 = vld [vmem:[#allocation4 + $0x50] sm:$0xff]  ;;  %v84_v54 = vld [vmem:[#allocation4 + $0x18] sm:$0xff] }
  0x21   :  { %164 = vmatpush.msra.mxu1 %v106_v31  ;;  %259 = vmatpush.msra.mxu3 %v225_v36  ;;  %v79_v52 = vld [vmem:[%s670_s0] sm:$0xff]  ;;  %v86_v55 = vld [vmem:[#allocation4 + $0x28] sm:$0xff]  ;;  %v88_v56 = vld [vmem:[#allocation4 + $0x38] sm:$0xff] }
  0x22   :  { %146 = vmatpush.msra.mxu0 %v99_v33  ;;  %186 = vmatpush.msra.mxu2 %v101_v34  ;;  %v213_v53 = vld [vmem:[#allocation7 + $0x60] sm:$0xff]  ;;  %v210_v57 = vld [vmem:[#allocation7 + $0x48] sm:$0xff]  ;;  %v83_v59 = vld [vmem:[#allocation4 + $0x10] sm:$0xff]  ;;  %v80_v60 = vmax.f32 %v79_v52, 0.0 }
  0x23   :  { %165 = vmatpush.msra.mxu1 %v103_v35  ;;  %260 = vmatpush.msra.mxu3 %v222_v40  ;;  %v81_v58 = vld [vmem:[#allocation4] sm:$0xff]  ;;  %v247_v61 = vld [vmem:[#allocation7 + $0x170] sm:$0xff]  ;;  %v244_v0 = vld [vmem:[#allocation7 + $0x158] sm:$0xff] }
  0x24   :  { %147 = vmatpush.msra.mxu0 %v96_v37  ;;  %187 = vmatpush.msra.mxu2 %v98_v38  ;;  %v85_v62 = vld [vmem:[#allocation4 + $0x20] sm:$0xff]  ;;  %v207_v63 = vld [vmem:[#allocation7 + $0x30] sm:$0xff]  ;;  %v82_v1 = vld [vmem:[#allocation4 + $0x8] sm:$0xff] }
  0x25   :  { %166 = vmatpush.msra.mxu1 %v100_v39  ;;  %261 = vmatpush.msra.mxu3 %v219_v44  ;;  %v241_v2 = vld [vmem:[#allocation7 + $0x140] sm:$0xff]  ;;  %v204_v3 = vld [vmem:[#allocation7 + $0x18] sm:$0xff]  ;;  %v238_v5 = vld [vmem:[#allocation7 + $0x128] sm:$0xff] }
  0x26   :  { %148 = vmatpush.msra.mxu0 %v93_v41  ;;  %188 = vmatpush.msra.mxu2 %v95_v42  ;;  %v248_v4 = vld [vmem:[#allocation7 + $0x178] sm:$0xff]  ;;  %v201_v6 = vld [vmem:[#allocation7] sm:$0xff]  ;;  %v235_v8 = vld [vmem:[#allocation7 + $0x110] sm:$0xff] }
  0x27   :  { %167 = vmatpush.msra.mxu1 %v97_v43  ;;  %262 = vmatpush.msra.mxu3 %v216_v48  ;;  %v245_v7 = vld [vmem:[#allocation7 + $0x160] sm:$0xff]  ;;  %v242_v10 = vld [vmem:[#allocation7 + $0x148] sm:$0xff]  ;;  %v232_v11 = vld [vmem:[#allocation7 + $0xf8] sm:$0xff] }
  0x28   :  { %149 = vmatpush.msra.mxu0 %v90_v45  ;;  %189 = vmatpush.msra.mxu2 %v92_v46  ;;  %v644_v9 = vld [vmem:[%s675_s5] sm:$0x1]  ;;  %v239_v12 = vld [vmem:[#allocation7 + $0x130] sm:$0xff]  ;;  %v236_v14 = vld [vmem:[#allocation7 + $0x118] sm:$0xff] }
  0x29   :  { %168 = vmatpush.msra.mxu1 %v94_v47  ;;  %263 = vmatpush.msra.mxu3 %v213_v53  ;;  %v229_v13 = vld [vmem:[#allocation7 + $0xe0] sm:$0xff]  ;;  %v226_v15 = vld [vmem:[#allocation7 + $0xc8] sm:$0xff]  ;;  %v223_v17 = vld [vmem:[#allocation7 + $0xb0] sm:$0xff] }
  0x2a   :  { %150 = vmatpush.msra.mxu0 %v87_v49  ;;  %190 = vmatpush.msra.mxu2 %v89_v50  ;;  %v233_v16 = vld [vmem:[#allocation7 + $0x100] sm:$0xff]  ;;  %v230_v18 = vld [vmem:[#allocation7 + $0xe8] sm:$0xff]  ;;  %v220_v19 = vld [vmem:[#allocation7 + $0x98] sm:$0xff] }
  0x2b   :  { %169 = vmatpush.msra.mxu1 %v91_v51  ;;  %264 = vmatpush.msra.mxu3 %v210_v57  ;;  %v227_v20 = vld [vmem:[#allocation7 + $0xd0] sm:$0xff]  ;;  %v217_v21 = vld [vmem:[#allocation7 + $0x80] sm:$0xff]  ;;  %v224_v22 = vld [vmem:[#allocation7 + $0xb8] sm:$0xff]  ;;  %v577_v57 = vmov 0.0  }
  0x2c   :  { %151 = vmatpush.msra.mxu0 %v84_v54  ;;  %191 = vmatpush.msra.mxu2 %v86_v55  ;;  %v214_v23 = vld [vmem:[#allocation7 + $0x68] sm:$0xff]  ;;  %v221_v24 = vld [vmem:[#allocation7 + $0xa0] sm:$0xff]  ;;  %v211_v25 = vld [vmem:[#allocation7 + $0x50] sm:$0xff]  ;;  %200 = vst [vmem:[#allocation3] sm:$0xff] %v577_v57 }
  0x2d   :  { %170 = vmatpush.msra.mxu1 %v88_v56  ;;  %265 = vmatpush.msra.mxu3 %v207_v63  ;;  %v218_v26 = vld [vmem:[#allocation7 + $0x88] sm:$0xff]  ;;  %v208_v27 = vld [vmem:[#allocation7 + $0x38] sm:$0xff]  ;;  %v215_v28 = vld [vmem:[#allocation7 + $0x70] sm:$0xff] }
  0x2e   :  { %152 = vmatpush.msra.mxu0 %v81_v58  ;;  %192 = vmatpush.msra.mxu2 %v83_v59  ;;  %v205_v29 = vld [vmem:[#allocation7 + $0x20] sm:$0xff]  ;;  %v212_v30 = vld [vmem:[#allocation7 + $0x58] sm:$0xff]  ;;  %v202_v31 = vld [vmem:[#allocation7 + $0x8] sm:$0xff] }
  0x2f   :  { %193 = vmatmul.f32.vlgmr.msra.gmra.mxu2 %v80_v60  ;;  %171 = vmatpush.msra.mxu1 %v85_v62  ;;  %v209_v32 = vld [vmem:[#allocation7 + $0x40] sm:$0xff]  ;;  %v206_v33 = vld [vmem:[#allocation7 + $0x28] sm:$0xff]  ;;  %v203_v34 = vld [vmem:[#allocation7 + $0x10] sm:$0xff] }
  0x30   :  { %272 = vmatpush.msrb.mxu0 %v247_v61  ;;  %266 = vmatpush.msra.mxu3 %v204_v3  ;;  %v129_v35 = vld [vmem:[%s673_s3] sm:$0x7]  ;;  %v383_v45 = vld [vmem:[#allocation9 + $0x78] sm:$0xff]  ;;  %v382_v47 = vld [vmem:[#allocation9 + $0x70] sm:$0xff] }
  0x31   :  { %172 = vmatpush.msra.mxu1 %v82_v1  ;;  %153 = vmatmul.f32.vlgmr.msra.gmra.mxu0 %v80_v60  ;;  %v131_v36 = vperm.slane %v129_v35, 0  ;;  %v132_v37 = vperm.slane %v129_v35, 1  ;;  %v133_v39 = vperm.slane %v129_v35, 2  ;;  %v381_v50 = vld [vmem:[#allocation9 + $0x68] sm:$0xff]  ;;  %v380_v52 = vld [vmem:[#allocation9 + $0x60] sm:$0xff]  ;;  %v379_v53 = vld [vmem:[#allocation9 + $0x58] sm:$0xff] }
  0x32   :  { %273 = vmatpush.msrb.mxu0 %v244_v0  ;;  %173 = vmatmul.f32.vlgmr.msra.gmra.mxu1 %v80_v60  ;;  %v378_v54 = vld [vmem:[#allocation9 + $0x50] sm:$0xff]  ;;  %v377_v55 = vld [vmem:[#allocation9 + $0x48] sm:$0xff]  ;;  %v376_v58 = vld [vmem:[#allocation9 + $0x40] sm:$0xff] }
  0x33   :  { %292 = vmatpush.msrb.mxu1 %v248_v4  ;;  %267 = vmatpush.msra.mxu3 %v201_v6  ;;  %v375_v60 = vld [vmem:[#allocation9 + $0x38] sm:$0xff]  ;;  %v374_v63 = vld [vmem:[#allocation9 + $0x30] sm:$0xff]  ;;  %v373_v1 = vld [vmem:[#allocation9 + $0x28] sm:$0xff] }
  0x34   :  { %274 = vmatpush.msrb.mxu0 %v241_v2  ;;  %268 = vmatmul.f32.vlgmr.msra.gmra.mxu3 %v644_v9  ;;  %v372_v3 = vld [vmem:[#allocation9 + $0x20] sm:$0xff]  ;;  %v371_v6 = vld [vmem:[#allocation9 + $0x18] sm:$0xff] }
  0x35   :  { %293 = vmatpush.msrb.mxu1 %v245_v7  ;;  %388 = vmatpush.msrb.mxu2 %v383_v45  ;;  %v370_v7 = vld [vmem:[#allocation9 + $0x10] sm:$0xff] }
  0x36   :  { %275 = vmatpush.msrb.mxu0 %v238_v5 }
  0x37   :  { %294 = vmatpush.msrb.mxu1 %v242_v10  ;;  %389 = vmatpush.msrb.mxu2 %v382_v47  ;;  %v369_v10 = vld [vmem:[#allocation9 + $0x8] sm:$0xff] }
  0x38   :  { %276 = vmatpush.msrb.mxu0 %v235_v8 }
  0x39   :  { %295 = vmatpush.msrb.mxu1 %v239_v12  ;;  %390 = vmatpush.msrb.mxu2 %v381_v50 }
  0x3a   :  { %277 = vmatpush.msrb.mxu0 %v232_v11 }
  0x3b   :  { %296 = vmatpush.msrb.mxu1 %v236_v14  ;;  %391 = vmatpush.msrb.mxu2 %v380_v52 }
  0x3c   :  { %278 = vmatpush.msrb.mxu0 %v229_v13  ;;  %v368_v13 = vld [vmem:[#allocation9] sm:$0xff] }
  0x3d   :  { %297 = vmatpush.msrb.mxu1 %v233_v16  ;;  %392 = vmatpush.msrb.mxu2 %v379_v53 }
  0x3e   :  { %279 = vmatpush.msrb.mxu0 %v226_v15  ;;  %v249_v15 = vld [vmem:[%s674_s4] sm:$0x1] }
  0x3f   :  { %298 = vmatpush.msrb.mxu1 %v230_v18  ;;  %393 = vmatpush.msrb.mxu2 %v378_v54 }
  0x40   :  { %280 = vmatpush.msrb.mxu0 %v223_v17 }
  0x41   :  { %299 = vmatpush.msrb.mxu1 %v227_v20  ;;  %394 = vmatpush.msrb.mxu2 %v377_v55 }
  0x42   :  { %281 = vmatpush.msrb.mxu0 %v220_v19 }
  0x43   :  { %300 = vmatpush.msrb.mxu1 %v224_v22  ;;  %395 = vmatpush.msrb.mxu2 %v376_v58 }
  0x44   :  { %282 = vmatpush.msrb.mxu0 %v217_v21 }
  0x45   :  { %301 = vmatpush.msrb.mxu1 %v221_v24  ;;  %396 = vmatpush.msrb.mxu2 %v375_v60 }
  0x46   :  { %283 = vmatpush.msrb.mxu0 %v214_v23 }
  0x47   :  { %302 = vmatpush.msrb.mxu1 %v218_v26  ;;  %397 = vmatpush.msrb.mxu2 %v374_v63 }
  0x48   :  { %284 = vmatpush.msrb.mxu0 %v211_v25 }
  0x49   :  { %303 = vmatpush.msrb.mxu1 %v215_v28  ;;  %398 = vmatpush.msrb.mxu2 %v373_v1 }
  0x4a   :  { %285 = vmatpush.msrb.mxu0 %v208_v27 }
  0x4b   :  { %304 = vmatpush.msrb.mxu1 %v212_v30  ;;  %399 = vmatpush.msrb.mxu2 %v372_v3 }
  0x4c   :  { %286 = vmatpush.msrb.mxu0 %v205_v29 }
  0x4d   :  { %305 = vmatpush.msrb.mxu1 %v209_v32  ;;  %400 = vmatpush.msrb.mxu2 %v371_v6 }
  0x4e   :  { %287 = vmatpush.msrb.mxu0 %v202_v31 }
  0x4f   :  { %288 = vmatmul.f32.vlgmr.msrb.gmra.mxu0 %v644_v9  ;;  %306 = vmatpush.msrb.mxu1 %v206_v33 }
  0x50   :  { %401 = vmatpush.msrb.mxu2 %v370_v7 }
  0x51   :  { %307 = vmatpush.msrb.mxu1 %v203_v34 }
  0x52   :  { %308 = vmatmul.f32.vlgmr.msrb.gmra.mxu1 %v644_v9  ;;  %402 = vmatpush.msrb.mxu2 %v369_v10 }
  0x54   :  { %403 = vmatpush.msrb.mxu2 %v368_v13 }
  0xae   :  { %v154_v38 = vpop.f32.mrf.mxu0 }
  0xaf   :  { %v155_v40 = vadd.f32 %v154_v38, %v131_v36  ;;  %v174_v41 = vpop.f32.mrf.mxu1 }
  0xb0   :  { %v175_v42 = vadd.f32 %v174_v41, %v132_v37 }
  0xb1   :  { %197 = vst [vmem:[#allocation2] sm:$0xff] %v155_v40 }
  0xb2   :  { %v194_v43 = vpop.f32.mrf.mxu2  ;;  %198 = vst [vmem:[#allocation2 + $0x8] sm:$0xff] %v175_v42 }
  0xb3   :  { %v195_v44 = vadd.f32 %v194_v43, %v133_v39  ;;  %v453_v43 = vld [vmem:[%s677_s7] ss:$0 sm:$0xff] }
  0xb5   :  { %199 = vst [vmem:[#allocation2 + $0x10] sm:$0xff] %v195_v44 }
  0xb7   :  { %v269_v46 = vpop.f32.mrf.mxu3 }
  0xbc   :  { %v652_v48 = vld [vmem:[#allocation2] ss:$8 sm:$0x7] }
  0xbd   :  { %v312_v49 = vadd.f32 %v269_v46, %v652_v48  ;;  %v333_v61 = vrot.slane %v652_v48, 1  ;;  %v357_v26 = vrot.slane %v652_v48, 2 }
  0xbf   :  { %v442_v51 = vmul.f32 -1.442695, %v312_v49 }
  0xc1   :  { %454 = vpow2.f32 %v442_v51 }
  0xc7   :  { %v455_v56 = vpop.eup %454 }
  0xc8   :  { %v316_v59 = vadd.f32 1.0, %v455_v56 }
  0xca   :  { %456 = vrcp.f32 %v316_v59  ;;  %v328_v12 = vand.u32 2147483648, %v316_v59  ;;  %vm322_vm0 = vweird.f32 %v316_v59  ;;  %v326_v17 = vand.u32 2147483647, %v316_v59 }
  0xcc   :  { %v289_v62 = vpop.f32.mrf.mxu0  ;;  %v329_v20 = vor.u32 1.1754944e-38, %v328_v12  ;;  %vm327_vm3 = vcmp.eq.f32.partialorder %v326_v17, 8.507059e+37 }
  0xcd   :  { %v335_v0 = vadd.f32 %v333_v61, %v289_v62 }
  0xcf   :  { %v443_v2 = vmul.f32 -1.442695, %v335_v0  ;;  %v309_v16 = vpop.f32.mrf.mxu1 }
  0xd0   :  { %v457_v4 = vpop.eup %456  ;;  %v355_v21 = vadd.f32 %v309_v16, %v249_v15 }
  0xd1   :  { %458 = vpow2.f32 %v443_v2  ;;  %v318_v5 = vmul.f32 %v457_v4, %v316_v59  ;;  %vm323_vm1 = vweird.f32 %v457_v4 }
  0xd2   :  { %vm324_vm2 = vmor %vm322_vm0, %vm323_vm1 }
  0xd3   :  { %v319_v8 = vsub.f32 1.0, %v318_v5 }
  0xd5   :  { %v320_v11 = vmul.f32 %v457_v4, %v319_v8 }
  0xd7   :  { %v459_v14 = vpop.eup %458  ;;  %v321_v19 = vadd.f32 %v457_v4, %v320_v11 }
  0xd8   :  { %v339_v18 = vadd.f32 1.0, %v459_v14 }
  0xd9   :  { %v325_v22 = vsel %vm324_vm2, %v457_v4, %v321_v19 }
  0xda   :  { %460 = vrcp.f32 %v339_v18  ;;  %v330_v23 = vsel %vm327_vm3, %v329_v20, %v325_v22  ;;  %v351_v30 = vand.u32 2147483648, %v339_v18  ;;  %v349_v32 = vand.u32 2147483647, %v339_v18 }
  0xdb   :  { %v356_v24 = vmul.f32 %v355_v21, %v330_v23  ;;  %vm345_vm5 = vweird.f32 %v339_v18 }
  0xdc   :  { %v352_v34 = vor.u32 1.1754944e-38, %v351_v30  ;;  %vm350_vm7 = vcmp.eq.f32.partialorder %v349_v32, 8.507059e+37 }
  0xdd   :  { %v359_v28 = vadd.f32 %v357_v26, %v356_v24 }
  0xdf   :  { %462 = vtanh.f32 %v359_v28 }
  0xe0   :  { %v461_v25 = vpop.eup %460 }
  0xe1   :  { %v341_v27 = vmul.f32 %v461_v25, %v339_v18  ;;  %vm346_vm4 = vweird.f32 %v461_v25 }
  0xe2   :  { %vm347_vm6 = vmor %vm345_vm5, %vm346_vm4 }
  0xe3   :  { %v342_v29 = vsub.f32 1.0, %v341_v27 }
  0xe5   :  { %v343_v31 = vmul.f32 %v461_v25, %v342_v29  ;;  %v463_v38 = vpop.eup %462 }
  0xe7   :  { %v344_v33 = vadd.f32 %v461_v25, %v343_v31 }
  0xe9   :  { %v348_v35 = vsel %vm347_vm6, %v461_v25, %v344_v33 }
  0xea   :  { %v353_v36 = vsel %vm350_vm7, %v352_v34, %v348_v35 }
  0xeb   :  { %v361_v37 = vsub.f32 1.0, %v353_v36  ;;  %v363_v40 = vmul.f32 %v353_v36, %v644_v9 }
  0xed   :  { %v362_v39 = vmul.f32 %v463_v38, %v361_v37 }
  0xef   :  { %v364_v41 = vadd.f32 %v363_v40, %v362_v39 }
  0xf1   :  { %365 = vst [vmem:[#allocation3] sm:$0x1] %v364_v41 }
  0xf2   :  { %366 = vst [vmem:[#allocation10] sm:$0x1] %v364_v41 }
  0xf3   :  { %432 = dma.vmem_to_hbm [thread:$0]  %s428_s11, 16, %s430_s14, [#allocation6]  }
  0xf8   :  { %v367_v42 = vld [vmem:[#allocation3] sm:$0xff] }
  0xf9   :  { %404 = vmatmul.f32.vlgmr.msrb.gmra.mxu2 %v367_v42 }
 0x17c   :  { %v405_v44 = vpop.f32.mrf.mxu2 }
 0x17d   :  { %v406_v45 = vadd.f32 %v453_v43, %v405_v44 }
 0x17f   :  { %408 = vmax.xlane.f32.xlu0 %v406_v45 }
 0x1f2   :  { %v409_v46 = vpop.xlane.xlu0 %408 }
 0x1f3   :  { %v410_v47 = vsub.f32 %v406_v45, %v409_v46 }
 0x1f5   :  { %v411_v48 = vmul.f32 1.442695, %v410_v47 }
 0x1f7   :  { %464 = vpow2.f32 %v411_v48 }
 0x1fd   :  { %v465_v49 = vpop.eup %464 }
 0x1fe   :  { %413 = vadd.xlane.f32.xlu0 %v465_v49 }
 0x271   :  { %v414_v9 = vpop.xlane.xlu0 %413 }
 0x272   :  { %466 = vlog2.f32 %v414_v9 }
 0x278   :  { %v467_v50 = vpop.eup %466 }
 0x279   :  { %v416_v51 = vmul.f32 0.6931472, %v467_v50 }
 0x27b   :  { %v417_v52 = vadd.f32 %v416_v51, %v409_v46 }
 0x27d   :  { %v418_v53 = vsub.f32 %v406_v45, %v417_v52 }
 0x27f   :  { %419 = vst [vmem:[%s678_s8] sm:$0xff] %v418_v53 }
 0x280   :  { %568 = dma.done.wait [#allocation6], 16  }
 0x281   :  { %569 = vsyncadd [#allocation6], 4294967280 }
 0x282   :  { %439 = vsyncpa [#allocation5], 1 }
 0x283   :  { %440 = vsyncpa [#allocation8], 1 }
 0x284   :  { %441 = vsyncpa [#allocation6], 1 }

</bundles_post_ra>
